<compile_context>
chip_gen: v7x
topology: tpu7x:2x2x1
jax: 0.10.0
libtpu: 0.0.40
codegen_flags: <defaults>
</compile_context>

<pallas_src>
import functools

import jax
import jax.numpy as jnp
from jax import lax
from jax.experimental import pallas as pl
from jax.experimental.pallas import tpu as pltpu


def _pick_tile(dim, target, align):
    """Largest tile <= target that divides dim and is align-multiple; else full dim.

    Falling back to the full dimension is always legal on TPU (block == array dim).
    """
    if dim <= target:
        return dim
    for t in range(target, align - 1, -1):
        if dim % t == 0 and t % align == 0:
            return t
    return dim


# ---------------------------------------------------------------------------
# Kernel 1: tiled linear (bf16 matmul, f32 accumulation, bias epilogue, bf16 out)
# ---------------------------------------------------------------------------
def _matmul_bias_kernel(x_ref, w_ref, b_ref, o_ref, acc_ref):
    @pl.when(pl.program_id(2) == 0)
    def _():
        acc_ref[...] = jnp.zeros_like(acc_ref)

    acc_ref[...] += jnp.dot(x_ref[...], w_ref[...],
                            preferred_element_type=jnp.float32)

    @pl.when(pl.program_id(2) == pl.num_programs(2) - 1)
    def _():
        o_ref[...] = (acc_ref[...] + b_ref[...]).astype(o_ref.dtype)


def linear_tiled(x_bf16, w_bf16, b_f32, *, tm=512, tn=512, tk=512):
    M, K = x_bf16.shape
    N = w_bf16.shape[1]
    tm = _pick_tile(M, tm, 8)
    tn = _pick_tile(N, tn, 128)
    tk = _pick_tile(K, tk, 128)
    grid = (M // tm, N // tn, K // tk)
    return pl.pallas_call(
        _matmul_bias_kernel,
        out_shape=jax.ShapeDtypeStruct((M, N), jnp.bfloat16),
        grid=grid,
        in_specs=[
            pl.BlockSpec((tm, tk), lambda i, j, k: (i, k)),
            pl.BlockSpec((tk, tn), lambda i, j, k: (k, j)),
            pl.BlockSpec((1, tn), lambda i, j, k: (0, j)),
        ],
        out_specs=pl.BlockSpec((tm, tn), lambda i, j, k: (i, j)),
        scratch_shapes=[pltpu.VMEM((tm, tn), jnp.float32)],
        compiler_params=pltpu.CompilerParams(
            dimension_semantics=("parallel", "parallel", "arbitrary")),
    )(x_bf16, w_bf16, b_f32.reshape(1, N))


# ---------------------------------------------------------------------------
# Kernel 2: LayerNorm only (embedding LN), f32 stats, bf16 store
# ---------------------------------------------------------------------------
def _ln_kernel(x_ref, g_ref, b_ref, o_ref, *, eps):
    x = x_ref[...].astype(jnp.float32)
    mu = jnp.mean(x, axis=1, keepdims=True)
    var = jnp.mean(jnp.square(x - mu), axis=1, keepdims=True)
    y = (x - mu) * lax.rsqrt(var + eps) * g_ref[...] + b_ref[...]
    o_ref[...] = y.astype(o_ref.dtype)


def layernorm(x, gamma, beta, eps=1e-12, tm=512):
    M, H = x.shape
    tm = _pick_tile(M, tm, 8)
    return pl.pallas_call(
        functools.partial(_ln_kernel, eps=eps),
        out_shape=jax.ShapeDtypeStruct((M, H), jnp.bfloat16),
        grid=(M // tm,),
        in_specs=[
            pl.BlockSpec((tm, H), lambda i: (i, 0)),
            pl.BlockSpec((1, H), lambda i: (0, 0)),
            pl.BlockSpec((1, H), lambda i: (0, 0)),
        ],
        out_specs=pl.BlockSpec((tm, H), lambda i: (i, 0)),
        compiler_params=pltpu.CompilerParams(dimension_semantics=("parallel",)),
    )(x, gamma.reshape(1, H), beta.reshape(1, H))


# ---------------------------------------------------------------------------
# Kernel 3: fused attention over [seq ; knowledge] keys (joint softmax, additive
# knowledge mask, two score dots — no key/value concat) + out-proj + residual + LN.
# Grid = (B, S // tq); K/V/weights are resident across query tiles.
# ---------------------------------------------------------------------------
def _attn_out_ln_kernel(q_ref, k_ref, v_ref, kk_ref, kv_ref, bias_ref, res_ref,
                        wo_ref, bo_ref, g_ref, b_ref, o_ref, *, eps):
    q = q_ref[...]                                                    # (tq, H) bf16
    # q is pre-scaled (1/sqrt(H) folded into the Q columns of w_qkv at init)
    s_seq = lax.dot_general(q, k_ref[...], (((1,), (1,)), ((), ())),
                            preferred_element_type=jnp.float32)       # (tq, S)
    s_kn = lax.dot_general(q, kk_ref[...], (((1,), (1,)), ((), ())),
                           preferred_element_type=jnp.float32)        # (tq, Kn)
    s_kn = s_kn + bias_ref[...]                                       # (1, Kn) mask
    # joint softmax over the two score pieces (no HBM/VMEM concat)
    m = jnp.maximum(jnp.max(s_seq, axis=1, keepdims=True),
                    jnp.max(s_kn, axis=1, keepdims=True))
    p_seq = jnp.exp(s_seq - m)
    p_kn = jnp.exp(s_kn - m)
    denom = (jnp.sum(p_seq, axis=1, keepdims=True)
             + jnp.sum(p_kn, axis=1, keepdims=True))
    ctx = (jnp.dot(p_seq.astype(jnp.bfloat16), v_ref[...],
                   preferred_element_type=jnp.float32)
           + jnp.dot(p_kn.astype(jnp.bfloat16), kv_ref[...],
                     preferred_element_type=jnp.float32))
    ctx = ctx * pl.reciprocal(denom, approx=True)
    attn = jnp.dot(ctx.astype(jnp.bfloat16), wo_ref[...],
                   preferred_element_type=jnp.float32) + bo_ref[...]
    h = attn + res_ref[...].astype(jnp.float32)
    mu = jnp.mean(h, axis=1, keepdims=True)
    var = jnp.mean(jnp.square(h - mu), axis=1, keepdims=True)
    o_ref[...] = ((h - mu) * lax.rsqrt(var + eps) * g_ref[...]
                  + b_ref[...]).astype(o_ref.dtype)


def attention_block(qkv, kn_qkv, bias, res, wo_bf16, bo, gamma, beta,
                    eps=1e-12, tq=256):
    B, S, H3 = qkv.shape
    H = H3 // 3
    Kn = kn_qkv.shape[0]
    tq = _pick_tile(S, tq, 8)
    return pl.pallas_call(
        functools.partial(_attn_out_ln_kernel, eps=eps),
        out_shape=jax.ShapeDtypeStruct((B, S, H), jnp.bfloat16),
        grid=(B, S // tq),
        in_specs=[
            # same (B,S,3H) array passed 3x; column-block index maps pick q/k/v
            pl.BlockSpec((None, tq, H), lambda b, i: (b, i, 0)),   # q tile
            pl.BlockSpec((None, S, H), lambda b, i: (b, 0, 1)),    # seq keys (full S)
            pl.BlockSpec((None, S, H), lambda b, i: (b, 0, 2)),    # seq values
            # (Kn,3H) knowledge projections passed 2x; pick k/v column blocks
            pl.BlockSpec((Kn, H), lambda b, i: (0, 1)),            # knowledge keys
            pl.BlockSpec((Kn, H), lambda b, i: (0, 2)),            # knowledge values
            pl.BlockSpec((None, 1, Kn), lambda b, i: (b, 0, 0)),   # additive mask
            pl.BlockSpec((None, tq, H), lambda b, i: (b, i, 0)),   # residual
            pl.BlockSpec((H, H), lambda b, i: (0, 0)),             # wo
            pl.BlockSpec((1, H), lambda b, i: (0, 0)),             # bo
            pl.BlockSpec((1, H), lambda b, i: (0, 0)),             # ln gamma
            pl.BlockSpec((1, H), lambda b, i: (0, 0)),             # ln beta
        ],
        out_specs=pl.BlockSpec((None, tq, H), lambda b, i: (b, i, 0)),
        compiler_params=pltpu.CompilerParams(
            dimension_semantics=("parallel", "parallel")),
    )(qkv, qkv, qkv, kn_qkv, kn_qkv, bias, res, wo_bf16, bo.reshape(1, H),
      gamma.reshape(1, H), beta.reshape(1, H))


# ---------------------------------------------------------------------------
# Kernel 4: fused FFN, F-tiled accumulation
#   acc += gelu(x @ w1[:, f] + b1[f]) @ w2[f, :];  last f: +b2, residual, LN, bf16 store
# ---------------------------------------------------------------------------
def _ffn_ln_kernel(x_ref, w1_ref, b1_ref, w2_ref, b2_ref, g_ref, b_ref,
                   o_ref, acc_ref, *, eps):
    @pl.when(pl.program_id(1) == 0)
    def _():
        acc_ref[...] = jnp.zeros_like(acc_ref)

    h1 = jnp.dot(x_ref[...], w1_ref[...],
                 preferred_element_type=jnp.float32) + b1_ref[...]
    h1 = jax.nn.gelu(h1)
    acc_ref[...] += jnp.dot(h1.astype(jnp.bfloat16), w2_ref[...],
                            preferred_element_type=jnp.float32)

    @pl.when(pl.program_id(1) == pl.num_programs(1) - 1)
    def _():
        h = acc_ref[...] + b2_ref[...] + x_ref[...].astype(jnp.float32)
        mu = jnp.mean(h, axis=1, keepdims=True)
        var = jnp.mean(jnp.square(h - mu), axis=1, keepdims=True)
        o_ref[...] = ((h - mu) * lax.rsqrt(var + eps) * g_ref[...]
                      + b_ref[...]).astype(o_ref.dtype)


def ffn_block(x_bf16, w1_bf16, b1, w2_bf16, b2, gamma, beta,
              eps=1e-12, tm=256, tf=512):
    M, H = x_bf16.shape
    F = w1_bf16.shape[1]
    tm = _pick_tile(M, tm, 8)
    tf = _pick_tile(F, tf, 128)
    return pl.pallas_call(
        functools.partial(_ffn_ln_kernel, eps=eps),
        out_shape=jax.ShapeDtypeStruct((M, H), jnp.bfloat16),
        grid=(M // tm, F // tf),
        in_specs=[
            pl.BlockSpec((tm, H), lambda i, f: (i, 0)),
            pl.BlockSpec((H, tf), lambda i, f: (0, f)),
            pl.BlockSpec((1, tf), lambda i, f: (0, f)),
            pl.BlockSpec((tf, H), lambda i, f: (f, 0)),
            pl.BlockSpec((1, H), lambda i, f: (0, 0)),
            pl.BlockSpec((1, H), lambda i, f: (0, 0)),
            pl.BlockSpec((1, H), lambda i, f: (0, 0)),
        ],
        out_specs=pl.BlockSpec((tm, H), lambda i, f: (i, 0)),
        scratch_shapes=[pltpu.VMEM((tm, H), jnp.float32)],
        compiler_params=pltpu.CompilerParams(
            dimension_semantics=("parallel", "arbitrary")),
    )(x_bf16, w1_bf16, b1.reshape(1, F), w2_bf16, b2.reshape(1, H),
      gamma.reshape(1, H), beta.reshape(1, H))


# ---------------------------------------------------------------------------
# Kernel 5: fused head — pooler(tanh) + classifier + cross-entropy + argmax
# ---------------------------------------------------------------------------
def _head_kernel(cls_ref, wp_ref, bp_ref, wc_ref, bc_ref, lab_ref,
                 logits_ref, loss_ref, pred_ref):
    pooled = jnp.tanh(jnp.dot(cls_ref[...], wp_ref[...],
                              preferred_element_type=jnp.float32) + bp_ref[...])
    logits = jnp.dot(pooled.astype(jnp.bfloat16), wc_ref[...],
                     preferred_element_type=jnp.float32) + bc_ref[...]
    logits_ref[...] = logits
    labels = lab_ref[...]                                   # (B, 1) int32
    L = logits.shape[1]
    m = jnp.max(logits, axis=1, keepdims=True)
    lse = m + jnp.log(jnp.sum(jnp.exp(logits - m), axis=1, keepdims=True))
    idx = lax.broadcasted_iota(jnp.int32, logits.shape, 1)
    onehot = (idx == labels).astype(jnp.float32)
    gold = jnp.sum(logits * onehot, axis=1, keepdims=True)
    loss_ref[...] = jnp.mean(lse - gold) * jnp.ones((1, 1), jnp.float32)
    # argmax (first max) via iota + min — avoids gather
    is_max = logits == m
    pred_ref[...] = jnp.min(jnp.where(is_max, idx, L), axis=1, keepdims=True)


def head(cls_bf16, wp_bf16, bp, wc_bf16, bc, labels):
    B, H = cls_bf16.shape
    L = wc_bf16.shape[1]
    logits, loss, pred = pl.pallas_call(
        _head_kernel,
        out_shape=(jax.ShapeDtypeStruct((B, L), jnp.float32),
                   jax.ShapeDtypeStruct((1, 1), jnp.float32),
                   jax.ShapeDtypeStruct((B, 1), jnp.int32)),
        grid=(1,),
        in_specs=[
            pl.BlockSpec((B, H), lambda i: (0, 0)),
            pl.BlockSpec((H, H), lambda i: (0, 0)),
            pl.BlockSpec((1, H), lambda i: (0, 0)),
            pl.BlockSpec((H, L), lambda i: (0, 0)),
            pl.BlockSpec((1, L), lambda i: (0, 0)),
            pl.BlockSpec((B, 1), lambda i: (0, 0)),
        ],
        out_specs=(pl.BlockSpec((B, L), lambda i: (0, 0)),
                   pl.BlockSpec((1, 1), lambda i: (0, 0)),
                   pl.BlockSpec((B, 1), lambda i: (0, 0))),
    )(cls_bf16, wp_bf16, bp.reshape(1, H), wc_bf16, bc.reshape(1, L),
      labels.reshape(B, 1).astype(jnp.int32))
    return loss[0, 0], pred[:, 0], logits


# ---------------------------------------------------------------------------
# Model glue (parameter init + forward composition)
# ---------------------------------------------------------------------------
def init_params(key, *, vocab, seq, hidden, ffn, num_layers, num_labels):
    def nrm(k, shape, scale=0.02):
        return scale * jax.random.normal(k, shape, dtype=jnp.float32)

    keys = iter(jax.random.split(key, 16 + num_layers * 8))
    p = {
        "tok_emb": nrm(next(keys), (vocab, hidden)),
        "pos_emb": nrm(next(keys), (seq, hidden)),
        "emb_ln_g": jnp.ones((hidden,), jnp.float32),
        "emb_ln_b": jnp.zeros((hidden,), jnp.float32),
        "wp": nrm(next(keys), (hidden, hidden)).astype(jnp.bfloat16),
        "bp": jnp.zeros((hidden,), jnp.float32),
        "wc": nrm(next(keys), (hidden, num_labels)).astype(jnp.bfloat16),
        "bc": jnp.zeros((num_labels,), jnp.float32),
        "layers": [],
    }
    att_scale = 1.0 / float(hidden) ** 0.5
    for _ in range(num_layers):
        # fold the 1/sqrt(H) softmax scale into the Q projection (weight AND bias=0)
        wq = nrm(next(keys), (hidden, hidden)) * att_scale
        wk = nrm(next(keys), (hidden, hidden))
        wv = nrm(next(keys), (hidden, hidden))
        lp = {
            # fused Q/K/V projection weight [H, 3H], bf16 for the MXU
            "w_qkv": jnp.concatenate([wq, wk, wv], axis=1).astype(jnp.bfloat16),
            "b_qkv": jnp.zeros((3 * hidden,), jnp.float32),
            "wo": nrm(next(keys), (hidden, hidden)).astype(jnp.bfloat16),
            "bo": jnp.zeros((hidden,), jnp.float32),
            "w1": nrm(next(keys), (hidden, ffn)).astype(jnp.bfloat16),
            "b1": jnp.zeros((ffn,), jnp.float32),
            "w2": nrm(next(keys), (ffn, hidden)).astype(jnp.bfloat16),
            "b2": jnp.zeros((hidden,), jnp.float32),
            "ln1_g": jnp.ones((hidden,), jnp.float32),
            "ln1_b": jnp.zeros((hidden,), jnp.float32),
            "ln2_g": jnp.ones((hidden,), jnp.float32),
            "ln2_b": jnp.zeros((hidden,), jnp.float32),
        }
        p["layers"].append(lp)
    return p


def glue_forward(params, token_ids, knowledge, knowledge_mask, labels):
    # matches: data['knowledge_mask'] = (1.0 - data['knowledge_mask']) * -100000.0
    add_mask = (1.0 - knowledge_mask) * -100000.0          # (B, Kn)

    B, S = token_ids.shape
    H = params["tok_emb"].shape[1]
    Kn = knowledge[0].shape[0]
    M = B * S

    # embeddings (glue: gather + pos add); LayerNorm-only Pallas kernel -> bf16
    x = jnp.take(params["tok_emb"], token_ids, axis=0) + params["pos_emb"][None, :, :]
    x2 = layernorm(x.reshape(M, H), params["emb_ln_g"], params["emb_ln_b"])  # (M,H) bf16

    bias = add_mask.reshape(B, 1, Kn)                       # additive knowledge mask

    for li, lp in enumerate(params["layers"]):
        kn = knowledge[li].astype(jnp.bfloat16)             # (Kn, H) per-layer bank
        # sequence QKV GEMM (bf16 in, bf16 out) and a tiny knowledge QKV GEMM —
        # no concat of knowledge rows onto the activations, no slice copies.
        qkv = linear_tiled(x2, lp["w_qkv"], lp["b_qkv"])          # (M, 3H) bf16
        kn_qkv = linear_tiled(kn, lp["w_qkv"], lp["b_qkv"])       # (Kn, 3H) bf16
        # fused: joint softmax over seq+knowledge keys -> out-proj -> residual -> LN
        x3 = attention_block(qkv.reshape(B, S, 3 * H), kn_qkv, bias,
                             x2.reshape(B, S, H),
                             lp["wo"], lp["bo"], lp["ln1_g"], lp["ln1_b"])
        x2 = x3.reshape(M, H)
        # fused FFN: F-tiled (w1 -> gelu -> w2) accumulation -> residual -> LN
        x2 = ffn_block(x2, lp["w1"], lp["b1"], lp["w2"], lp["b2"],
                       lp["ln2_g"], lp["ln2_b"])

    cls = x2.reshape(B, S, H)[:, 0, :]                      # [CLS] pooling, like BERT
    loss, prediction, logits = head(cls, params["wp"], params["bp"],
                                    params["wc"], params["bc"], labels)
    return {"loss": loss, "prediction": prediction, "logits": logits,
            "knowledge": knowledge}


# TODO(synk): the HuggingFace cs_model / sent_model internals (tokenizer, pretrained
# weights, gradient checkpointing) have no Pallas equivalent; replaced by a synthetic
# knowledge-augmented transformer with deterministic weights. The embedding gather
# stays in XLA (jnp.take).

if __name__ == "__main__":
    # small but lane-dense shapes (H multiple of 128, S/Kn multiples of 8)
    B, S, H, Kn, NUM_LAYERS, FFN, VOCAB, NUM_LABELS = 2, 16, 128, 8, 2, 256, 128, 2

    root = jax.random.PRNGKey(0)
    k_params, k_tok, k_kn, k_mask, k_lab = jax.random.split(root, 5)

    params = init_params(k_params, vocab=VOCAB, seq=S, hidden=H, ffn=FFN,
                         num_layers=NUM_LAYERS, num_labels=NUM_LABELS)

    token_ids = jax.random.randint(k_tok, (B, S), 0, VOCAB, dtype=jnp.int32)
    # synthetic per-layer knowledge bank (stand-in for cs_model hidden_states[:, 0, :])
    kn_keys = jax.random.split(k_kn, NUM_LAYERS)
    knowledge = [jax.random.normal(kn_keys[i], (Kn, H), dtype=jnp.float32)
                 for i in range(NUM_LAYERS)]
    knowledge_mask = jax.random.bernoulli(k_mask, 0.75, (B, Kn)).astype(jnp.float32)
    # ensure at least the first knowledge slot is visible per example
    knowledge_mask = knowledge_mask.at[:, 0].set(1.0)
    labels = jax.random.randint(k_lab, (B,), 0, NUM_LABELS, dtype=jnp.int32)

    out = glue_forward(params, token_ids, knowledge, knowledge_mask, labels)
    jax.block_until_ready((out["loss"], out["prediction"], out["logits"]))
    print("KERNEL_OK")
</pallas_src>

<mosaic_0001>
module attributes {stable_mosaic.version = 11 : i64} {
  func.func @_ln_kernel(%arg0: i32, %arg1: memref<32x128xf32, #tpu.memory_space<vmem>>, %arg2: memref<1x128xf32, #tpu.memory_space<vmem>>, %arg3: memref<1x128xf32, #tpu.memory_space<vmem>>, %arg4: memref<32x128xbf16, #tpu.memory_space<vmem>>) attributes {dimension_semantics = [#tpu.dimension_semantics<parallel>], iteration_bounds = array<i64: 1>, scalar_prefetch = 0 : i64, scratch_operands = 0 : i64, tpu.core_type = #tpu.core_type<tc>, window_params = [{transform_indices = @transform_0, window_bounds = array<i64: 32, 128>}, {pipeline_mode = #tpu.pipeline_mode<synchronous>, transform_indices = @transform_1, window_bounds = array<i64: 1, 128>}, {pipeline_mode = #tpu.pipeline_mode<synchronous>, transform_indices = @transform_2, window_bounds = array<i64: 1, 128>}, {transform_indices = @transform_3, window_bounds = array<i64: 32, 128>}]} {
    %c0 = arith.constant 0 : index
    %c0_0 = arith.constant 0 : index
    %0 = vector.load %arg1[%c0, %c0_0] : memref<32x128xf32, #tpu.memory_space<vmem>>, vector<32x128xf32>
    %cst = arith.constant dense<0.000000e+00> : vector<32xf32>
    %1 = vector.multi_reduction <add>, %0, %cst [1] : vector<32x128xf32> to vector<32xf32>
    %2 = vector.shape_cast %1 : vector<32xf32> to vector<32x1xf32>
    %cst_1 = arith.constant 1.280000e+02 : f32
    %3 = vector.broadcast %cst_1 : f32 to vector<32x1xf32>
    %4 = arith.divf %2, %3 : vector<32x1xf32>
    %5 = vector.broadcast %4 : vector<32x1xf32> to vector<32x128xf32>
    %6 = arith.subf %0, %5 : vector<32x128xf32>
    %7 = arith.mulf %6, %6 : vector<32x128xf32>
    %cst_2 = arith.constant dense<0.000000e+00> : vector<32xf32>
    %8 = vector.multi_reduction <add>, %7, %cst_2 [1] : vector<32x128xf32> to vector<32xf32>
    %9 = vector.shape_cast %8 : vector<32xf32> to vector<32x1xf32>
    %cst_3 = arith.constant 1.280000e+02 : f32
    %10 = vector.broadcast %cst_3 : f32 to vector<32x1xf32>
    %11 = arith.divf %9, %10 : vector<32x1xf32>
    %12 = vector.broadcast %4 : vector<32x1xf32> to vector<32x128xf32>
    %13 = arith.subf %0, %12 : vector<32x128xf32>
    %cst_4 = arith.constant 9.99999996E-13 : f32
    %14 = vector.broadcast %cst_4 : f32 to vector<32x1xf32>
    %15 = arith.addf %11, %14 : vector<32x1xf32>
    %16 = math.rsqrt %15 : vector<32x1xf32>
    %17 = vector.broadcast %16 : vector<32x1xf32> to vector<32x128xf32>
    %18 = arith.mulf %13, %17 : vector<32x128xf32>
    %c0_5 = arith.constant 0 : index
    %c0_6 = arith.constant 0 : index
    %19 = vector.load %arg2[%c0_5, %c0_6] : memref<1x128xf32, #tpu.memory_space<vmem>>, vector<1x128xf32>
    %20 = vector.broadcast %19 : vector<1x128xf32> to vector<32x128xf32>
    %21 = arith.mulf %18, %20 : vector<32x128xf32>
    %c0_7 = arith.constant 0 : index
    %c0_8 = arith.constant 0 : index
    %22 = vector.load %arg3[%c0_7, %c0_8] : memref<1x128xf32, #tpu.memory_space<vmem>>, vector<1x128xf32>
    %23 = vector.broadcast %22 : vector<1x128xf32> to vector<32x128xf32>
    %24 = arith.addf %21, %23 : vector<32x128xf32>
    %25 = arith.truncf %24 : vector<32x128xf32> to vector<32x128xbf16>
    %c0_9 = arith.constant 0 : index
    %c0_10 = arith.constant 0 : index
    %26 = vector.load %arg4[%c0_9, %c0_10] : memref<32x128xbf16, #tpu.memory_space<vmem>>, vector<32x128xbf16>
    tpu.vector_store %arg4[%c0_9, %c0_10], %25 {strides = array<i32>} : memref<32x128xbf16, #tpu.memory_space<vmem>>, vector<32x128xbf16>,
    return
  }
  func.func @transform_0(%arg0: i32) -> (i32, i32) {
    %c0_i32 = arith.constant 0 : i32
    %c0_i32_0 = arith.constant 0 : i32
    return %arg0, %c0_i32 : i32, i32
  }
  func.func @transform_1(%arg0: i32) -> (i32, i32) {
    %c0_i32 = arith.constant 0 : i32
    %c0_i32_0 = arith.constant 0 : i32
    %c0_i32_1 = arith.constant 0 : i32
    return %c0_i32, %c0_i32_0 : i32, i32
  }
  func.func @transform_2(%arg0: i32) -> (i32, i32) {
    %c0_i32 = arith.constant 0 : i32
    %c0_i32_0 = arith.constant 0 : i32
    %c0_i32_1 = arith.constant 0 : i32
    return %c0_i32, %c0_i32_0 : i32, i32
  }
  func.func @transform_3(%arg0: i32) -> (i32, i32) {
    %c0_i32 = arith.constant 0 : i32
    %c0_i32_0 = arith.constant 0 : i32
    return %arg0, %c0_i32 : i32, i32
  }
}

</mosaic_0001>

<bundles_post_ra>
// kernel: tpu_custom_call.1
= control target key start
LH: loop header
LB: loop body
LE: loop exit
PB: predicated region body
PF: predicated region fallthrough
CT: control target
= control target key end

     0   :  { %8 = vsyncpa [#allocation3], 0  ;;  %s276_s0 = inlined_call_operand.hbm [shape: f32[32,128], index: 0, kind: input, shape index: {}]   ;;  %s277_s1 = inlined_call_operand.vmem [shape: f32[1,128], index: 1, kind: input, shape index: {}]   ;;  %s278_s2 = inlined_call_operand.vmem [shape: f32[1,128], index: 2, kind: input, shape index: {}]   ;;  %s279_s3 = inlined_call_operand.hbm [shape: bf16[32,128], index: 3, kind: output, shape index: {}]  }
   0x1   :  { %9 = vsyncpa [#allocation4], 0  ;;  %s220_s12 = smov [#allocation2]   ;;  %s172_s16 = scalar_lea.hbm %s276_s0, 512 }
   0x2   :  { %s15_s13 = sshll.u32 %s220_s12, 4  ;;  %p173_p0 = scmp.ne.s32.totalorder %s276_s0, %s172_s16  ;;  %s16_s13 = int_to_ptr.vmem [resolvable:$true] %s15_s13 }
   0x3   :  { %p176_p1 = scmp.lt.u32.totalorder %s172_s16, %s276_s0 }
   0x5   :  { %p178_p2 = pnand %p176_p1, %p173_p0 }
   0x7   :  { %181 = shalt.err (!%p178_p2)
}
   0x8   :  { %s182_s21 = scalar_lea.vmem %s16_s13, 512  ;;  %p187_p4 = scmp.lt.s32.totalorder %s16_s13, %s16_s13 }
   0x9   :  { %p183_p3 = scmp.ne.s32.totalorder %s16_s13, %s182_s21  ;;  %p188_p5 = scmp.lt.s32.totalorder %s182_s21, %s182_s21 }
   0xb   :  { %p189_p6 = por %p188_p5, %p187_p4 }
   0xd   :  { %p190_p7 = pnand %p189_p6, %p183_p3 }
   0xf   :  { %193 = shalt.err (!%p190_p7)
}
  0x10   :  { %s221_s22 = smov 128   ;;  %s222_s23 = smov 8  }
  0x11   :  { %21 = dma.hbm_to_vmem [thread:$0]  %s276_s0, 512, %s16_s13, [#allocation3], %s221_s22, %s221_s22, %s222_s23  }
  0x12   :  { %216 = dma.done.wait [#allocation3], 512  }
  0x13   :  { %217 = vsyncadd [#allocation3], 4294966784  ;;  %v29_v0 = vld [vmem:[#allocation2] sm:$0xff]  ;;  %v31_v1 = vld [vmem:[#allocation2 + $0x10] sm:$0xff]  ;;  %s223_s29 = smov [#allocation5]  }
  0x14   :  { %33 = vadd.xlane.f32.xlu0 %v29_v0  ;;  %37 = vadd.xlane.f32.xlu1 %v31_v1  ;;  %v30_v2 = vld [vmem:[#allocation2 + $0x8] sm:$0xff]  ;;  %v32_v3 = vld [vmem:[#allocation2 + $0x18] sm:$0xff]  ;;  %v137_v34 = vld [vmem:[%s277_s1] ss:$0 sm:$0xff]  ;;  %s125_s30 = sshll.u32 %s223_s29, 4  ;;  %s126_s30 = int_to_ptr.vmem [resolvable:$true] %s125_s30 }
  0x15   :  { %v138_v40 = vld [vmem:[%s278_s2] ss:$0 sm:$0xff]  ;;  %s194_s1 = scalar_lea.vmem %s126_s30, 256  ;;  %p199_p9 = scmp.lt.s32.totalorder %s126_s30, %s126_s30 }
  0x16   :  { %p195_p8 = scmp.ne.s32.totalorder %s126_s30, %s194_s1  ;;  %p200_p10 = scmp.lt.s32.totalorder %s194_s1, %s194_s1 }
  0x18   :  { %35 = vadd.xlane.f32.xlu0 %v30_v2  ;;  %39 = vadd.xlane.f32.xlu1 %v32_v3  ;;  %p201_p11 = por %p200_p10, %p199_p9 }
  0x1a   :  { %p202_p12 = pnand %p201_p11, %p195_p8 }
  0xa1   :  { %v34_v4 = vpop.xlane.xlu0 %33  ;;  %v38_v5 = vpop.xlane.xlu1 %37 }
  0xa2   :  { %v42_v6 = vmul.f32 0.0078125, %v34_v4  ;;  %v44_v7 = vmul.f32 0.0078125, %v38_v5 }
  0xa4   :  { %v46_v8 = vsub.f32 %v29_v0, %v42_v6  ;;  %v48_v9 = vsub.f32 %v31_v1, %v44_v7 }
  0xa5   :  { %v36_v10 = vpop.xlane.xlu0 %35  ;;  %v40_v11 = vpop.xlane.xlu1 %39 }
  0xa6   :  { %v43_v12 = vmul.f32 0.0078125, %v36_v10  ;;  %v50_v13 = vmul.f32 %v46_v8, %v46_v8  ;;  %v45_v14 = vmul.f32 0.0078125, %v40_v11  ;;  %v52_v17 = vmul.f32 %v48_v9, %v48_v9 }
  0xa8   :  { %v47_v15 = vsub.f32 %v30_v2, %v43_v12  ;;  %54 = vadd.xlane.f32.xlu0 %v50_v13  ;;  %v49_v16 = vsub.f32 %v32_v3, %v45_v14 }
  0xaa   :  { %v51_v18 = vmul.f32 %v47_v15, %v47_v15  ;;  %v53_v19 = vmul.f32 %v49_v16, %v49_v16 }
  0xac   :  { %58 = vadd.xlane.f32.xlu0 %v52_v17  ;;  %56 = vadd.xlane.f32.xlu1 %v51_v18 }
  0xb0   :  { %60 = vadd.xlane.f32.xlu1 %v53_v19 }
 0x135   :  { %v55_v20 = vpop.xlane.xlu0 %54 }
 0x136   :  { %v62_v21 = vmul.f32 0.0078125, %v55_v20 }
 0x138   :  { %v66_v22 = vadd.f32 1e-12, %v62_v21 }
 0x139   :  { %v57_v23 = vpop.xlane.xlu1 %56  ;;  %v59_v24 = vpop.xlane.xlu0 %58 }
 0x13a   :  { %164 = vrsqrt.f32 %v66_v22  ;;  %v63_v25 = vmul.f32 0.0078125, %v57_v23  ;;  %v64_v26 = vmul.f32 0.0078125, %v59_v24 }
 0x13c   :  { %v67_v27 = vadd.f32 1e-12, %v63_v25  ;;  %v68_v28 = vadd.f32 1e-12, %v64_v26 }
 0x13d   :  { %v61_v29 = vpop.xlane.xlu1 %60 }
 0x13e   :  { %166 = vrsqrt.f32 %v67_v27  ;;  %v65_v30 = vmul.f32 0.0078125, %v61_v29 }
 0x13f   :  { %168 = vrsqrt.f32 %v68_v28 }
 0x140   :  { %v69_v31 = vadd.f32 1e-12, %v65_v30 }
 0x142   :  { %170 = vrsqrt.f32 %v69_v31 }
 0x144   :  { %v165_v32 = vpop.eup %164 }
 0x145   :  { %v74_v33 = vmul.f32 %v165_v32, %v46_v8 }
 0x147   :  { %v85_v38 = vmul.f32 %v137_v34, %v74_v33 }
 0x148   :  { %v167_v35 = vpop.eup %166 }
 0x149   :  { %v169_v36 = vpop.eup %168  ;;  %v75_v37 = vmul.f32 %v167_v35, %v47_v15  ;;  %v96_v45 = vadd.f32 %v138_v40, %v85_v38 }
 0x14a   :  { %v76_v39 = vmul.f32 %v169_v36, %v48_v9 }
 0x14b   :  { %v86_v41 = vmul.f32 %v137_v34, %v75_v37 }
 0x14c   :  { %v171_v42 = vpop.eup %170  ;;  %v87_v43 = vmul.f32 %v137_v34, %v76_v39 }
 0x14d   :  { %v77_v44 = vmul.f32 %v171_v42, %v49_v16  ;;  %v97_v46 = vadd.f32 %v138_v40, %v86_v41 }
 0x14e   :  { %v98_v49 = vadd.f32 %v138_v40, %v87_v43 }
 0x14f   :  { %v88_v47 = vmul.f32 %v137_v34, %v77_v44  ;;  %v150_v48 = vpack.c.bf16 %v97_v46, %v96_v45 }
 0x151   :  { %v99_v50 = vadd.f32 %v138_v40, %v88_v47  ;;  %151 = vst [vmem:[#allocation5] sm:$0xff] %v150_v48  }
 0x153   :  { %v155_v51 = vpack.c.bf16 %v99_v50, %v98_v49 }
 0x155   :  { %157 = vst [vmem:[#allocation5 + $0x8] sm:$0xff] %v155_v51  }
 0x156   :  { %205 = shalt.err (!%p202_p12)
}
 0x157   :  { %s206_s5 = scalar_lea.hbm %s279_s3, 256 }
 0x158   :  { %p207_p13 = scmp.ne.s32.totalorder %s279_s3, %s206_s5  ;;  %p210_p0 = scmp.lt.u32.totalorder %s206_s5, %s279_s3 }
 0x15a   :  { %p212_p1 = pnand %p210_p0, %p207_p13 }
 0x15c   :  { %215 = shalt.err (!%p212_p1)
}
 0x15d   :  { %s224_s10 = smov 64   ;;  %s225_s11 = smov 4  }
 0x15e   :  { %131 = dma.vmem_to_hbm [thread:$0]  %s126_s30, 256, %s279_s3, [#allocation4], %s224_s10, %s224_s10, %s225_s11  }
 0x15f   :  { %218 = dma.done.wait [#allocation4], 256  }
 0x160   :  { %219 = vsyncadd [#allocation4], 4294967040 }
 0x161   :  { %135 = vsyncpa [#allocation3], 1 }
 0x162   :  { %136 = vsyncpa [#allocation4], 1 }

</bundles_post_ra>
